<compile_context>
chip_gen: v7x
topology: tpu7x:2x2x1
jax: 0.10.0
libtpu: 0.0.40
codegen_flags: <defaults>
</compile_context>

<pallas_src>
import jax
import jax.numpy as jnp
from jax.experimental import pallas as pl
from jax.experimental.pallas import tpu as pltpu

_LANE = 128
_MAX_TILE_ROWS = 4096  # 4096 x 128 x 4B = 2 MiB per f32 block


def _mish_kernel(x_ref, o_ref):
    xf = x_ref[...].astype(jnp.float32)
    # PyTorch-style softplus threshold (softplus(x) = x for x > 20).
    # For x <= 20, with t = exp(x):
    #   tanh(softplus(x)) = tanh(log(1 + t)) = ((1+t)^2 - 1) / ((1+t)^2 + 1)
    #                     = (t^2 + 2t) / (t^2 + 2t + 2)
    t = jnp.exp(jnp.minimum(xf, 20.0))          # 1 EUP push
    num = t * (t + 2.0)                         # VALU
    den = num + 2.0                             # VALU
    r = pl.reciprocal(den, approx=True)         # 1 EUP push
    r = r * (2.0 - den * r)                     # Newton step (VALU) -> full f32 precision
    y = jnp.where(xf > 20.0, xf, xf * (num * r))
    o_ref[...] = y.astype(o_ref.dtype)


def mish(x: jax.Array) -> jax.Array:
    """Elementwise Mish. Accepts any shape; tiles a lane-dense (rows, 128) view."""
    orig_shape = x.shape
    orig_dtype = x.dtype
    n = x.size
    if n == 0:
        return x

    x_flat = jnp.reshape(x, (-1,))
    pad = (-n) % _LANE
    if pad:
        # Rare fallback (n not a multiple of 128): minimal tail pad only.
        x_flat = jnp.pad(x_flat, (0, pad))
    rows = x_flat.size // _LANE
    x2d = jnp.reshape(x_flat, (rows, _LANE))

    # tile_rows is either the full row extent (always a legal block) or 4096
    # (divisible by 8); a partial last block is handled via the cdiv grid.
    tile_rows = min(_MAX_TILE_ROWS, rows)
    grid = (pl.cdiv(rows, tile_rows),)

    out2d = pl.pallas_call(
        _mish_kernel,
        out_shape=jax.ShapeDtypeStruct((rows, _LANE), orig_dtype),
        grid=grid,
        in_specs=[pl.BlockSpec((tile_rows, _LANE), lambda i: (i, 0))],
        out_specs=pl.BlockSpec((tile_rows, _LANE), lambda i: (i, 0)),
        compiler_params=pltpu.CompilerParams(
            dimension_semantics=("parallel",)
        ),
    )(x2d)

    out_flat = jnp.reshape(out2d, (-1,))
    if pad:
        out_flat = out_flat[:n]
    return jnp.reshape(out_flat, orig_shape)


def _mish_ref(x):
    xf = x.astype(jnp.float32)
    sp = jnp.where(xf > 20.0, xf, jnp.log1p(jnp.exp(jnp.minimum(xf, 20.0))))
    return (xf * jnp.tanh(sp)).astype(x.dtype)


if __name__ == "__main__":
    key = jax.random.PRNGKey(0)
    x = jax.random.normal(key, (2, 4, 16, 16), dtype=jnp.float32)  # NCHW
    # Exercise the large-positive fast path and the very-negative tail.
    x = x.at[0, 0, 0, 0].set(25.0)
    x = x.at[0, 0, 0, 1].set(-30.0)

    y = mish(x)
    y = jax.block_until_ready(y)

    y_ref = _mish_ref(x)
    assert y.shape == x.shape and y.dtype == x.dtype
    assert jnp.allclose(y, y_ref, atol=1e-5, rtol=1e-5)
    print("KERNEL_OK")
</pallas_src>

<mosaic_0001>
module attributes {stable_mosaic.version = 11 : i64} {
  func.func @_mish_kernel(%arg0: i32, %arg1: memref<16x128xf32, #tpu.memory_space<vmem>>, %arg2: memref<16x128xf32, #tpu.memory_space<vmem>>) attributes {dimension_semantics = [#tpu.dimension_semantics<parallel>], iteration_bounds = array<i64: 1>, scalar_prefetch = 0 : i64, scratch_operands = 0 : i64, tpu.core_type = #tpu.core_type<tc>, window_params = [{transform_indices = @transform_0, window_bounds = array<i64: 16, 128>}, {transform_indices = @transform_1, window_bounds = array<i64: 16, 128>}]} {
    %c0 = arith.constant 0 : index
    %c0_0 = arith.constant 0 : index
    %0 = vector.load %arg1[%c0, %c0_0] : memref<16x128xf32, #tpu.memory_space<vmem>>, vector<16x128xf32>
    %cst = arith.constant 2.000000e+01 : f32
    %1 = vector.broadcast %cst : f32 to vector<16x128xf32>
    %2 = arith.minimumf %0, %1 : vector<16x128xf32>
    %3 = math.exp %2 : vector<16x128xf32>
    %cst_1 = arith.constant 2.000000e+00 : f32
    %4 = vector.broadcast %cst_1 : f32 to vector<16x128xf32>
    %5 = arith.addf %3, %4 : vector<16x128xf32>
    %6 = arith.mulf %3, %5 : vector<16x128xf32>
    %cst_2 = arith.constant 2.000000e+00 : f32
    %7 = vector.broadcast %cst_2 : f32 to vector<16x128xf32>
    %8 = arith.addf %6, %7 : vector<16x128xf32>
    %9 = tpu.reciprocal %8 {approx = true} : vector<16x128xf32> -> vector<16x128xf32>
    %10 = arith.mulf %8, %9 : vector<16x128xf32>
    %cst_3 = arith.constant 2.000000e+00 : f32
    %11 = vector.broadcast %cst_3 : f32 to vector<16x128xf32>
    %12 = arith.subf %11, %10 : vector<16x128xf32>
    %13 = arith.mulf %9, %12 : vector<16x128xf32>
    %cst_4 = arith.constant 2.000000e+01 : f32
    %14 = vector.broadcast %cst_4 : f32 to vector<16x128xf32>
    %15 = arith.cmpf ogt, %0, %14 : vector<16x128xf32>
    %16 = arith.mulf %6, %13 : vector<16x128xf32>
    %17 = arith.mulf %0, %16 : vector<16x128xf32>
    %18 = arith.select %15, %0, %17 : vector<16x128xi1>, vector<16x128xf32>
    %c0_5 = arith.constant 0 : index
    %c0_6 = arith.constant 0 : index
    %19 = vector.load %arg2[%c0_5, %c0_6] : memref<16x128xf32, #tpu.memory_space<vmem>>, vector<16x128xf32>
    tpu.vector_store %arg2[%c0_5, %c0_6], %18 {strides = array<i32>} : memref<16x128xf32, #tpu.memory_space<vmem>>, vector<16x128xf32>,
    return
  }
  func.func @transform_0(%arg0: i32) -> (i32, i32) {
    %c0_i32 = arith.constant 0 : i32
    %c0_i32_0 = arith.constant 0 : i32
    return %arg0, %c0_i32 : i32, i32
  }
  func.func @transform_1(%arg0: i32) -> (i32, i32) {
    %c0_i32 = arith.constant 0 : i32
    %c0_i32_0 = arith.constant 0 : i32
    return %arg0, %c0_i32 : i32, i32
  }
}

</mosaic_0001>

<bundles_post_ra>
// kernel: tpu_custom_call.1
= control target key start
LH: loop header
LB: loop body
LE: loop exit
PB: predicated region body
PF: predicated region fallthrough
CT: control target
= control target key end

     0   :  { %6 = vsyncpa [#allocation3], 0  ;;  %s176_s0 = inlined_call_operand.hbm [shape: f32[16,128], index: 0, kind: input, shape index: {}]   ;;  %s177_s1 = inlined_call_operand.hbm [shape: f32[16,128], index: 1, kind: output, shape index: {}]  }
   0x1   :  { %7 = vsyncpa [#allocation4], 0  ;;  %s132_s6 = smov [#allocation2]   ;;  %s84_s10 = scalar_lea.hbm %s176_s0, 256 }
   0x2   :  { %s13_s7 = sshll.u32 %s132_s6, 4  ;;  %p85_p0 = scmp.ne.s32.totalorder %s176_s0, %s84_s10  ;;  %s14_s7 = int_to_ptr.vmem [resolvable:$true] %s13_s7 }
   0x3   :  { %p88_p1 = scmp.lt.u32.totalorder %s84_s10, %s176_s0 }
   0x5   :  { %p90_p2 = pnand %p88_p1, %p85_p0 }
   0x7   :  { %93 = shalt.err (!%p90_p2)
}
   0x8   :  { %s94_s15 = scalar_lea.vmem %s14_s7, 256  ;;  %p99_p4 = scmp.lt.s32.totalorder %s14_s7, %s14_s7 }
   0x9   :  { %p95_p3 = scmp.ne.s32.totalorder %s14_s7, %s94_s15  ;;  %p100_p5 = scmp.lt.s32.totalorder %s94_s15, %s94_s15 }
   0xb   :  { %p101_p6 = por %p100_p5, %p99_p4 }
   0xd   :  { %p102_p7 = pnand %p101_p6, %p95_p3 }
   0xf   :  { %105 = shalt.err (!%p102_p7)
}
  0x10   :  { %s133_s16 = smov 128   ;;  %s134_s17 = smov 8  }
  0x11   :  { %19 = dma.hbm_to_vmem [thread:$0]  %s176_s0, 256, %s14_s7, [#allocation3], %s133_s16, %s133_s16, %s134_s17  }
  0x12   :  { %128 = dma.done.wait [#allocation3], 256  }
  0x13   :  { %129 = vsyncadd [#allocation3], 4294967040  ;;  %v23_v0 = vld [vmem:[#allocation2] sm:$0xff]  ;;  %v24_v1 = vld [vmem:[#allocation2 + $0x8] sm:$0xff]  ;;  %s135_s0 = smov [#allocation5]  }
  0x14   :  { %v25_v2 = vmin.f32 %v23_v0, 20.0  ;;  %v26_v3 = vmin.f32 %v24_v1, 20.0  ;;  %vm45_vm0 = vcmp.gt.f32.partialorder %v23_v0, 20.0  ;;  %s60_s20 = sshll.u32 %s135_s0, 4  ;;  %vm46_vm1 = vcmp.gt.f32.partialorder %v24_v1, 20.0  ;;  %s61_s20 = int_to_ptr.vmem [resolvable:$true] %s60_s20 }
  0x15   :  { %s106_s21 = scalar_lea.vmem %s61_s20, 256  ;;  %p111_p9 = scmp.lt.s32.totalorder %s61_s20, %s61_s20 }
  0x16   :  { %v27_v4 = vmul.f32 1.442695, %v25_v2  ;;  %v29_v5 = vmul.f32 1.442695, %v26_v3  ;;  %p107_p8 = scmp.ne.s32.totalorder %s61_s20, %s106_s21  ;;  %p112_p10 = scmp.lt.s32.totalorder %s106_s21, %s106_s21 }
  0x18   :  { %76 = vpow2.f32 %v27_v4  ;;  %p113_p11 = por %p112_p10, %p111_p9 }
  0x19   :  { %78 = vpow2.f32 %v29_v5 }
  0x1a   :  { %p114_p12 = pnand %p113_p11, %p107_p8 }
  0x22   :  { %v77_v6 = vpop.eup %76 }
  0x23   :  { %v79_v7 = vpop.eup %78  ;;  %v31_v8 = vadd.f32 2.0, %v77_v6 }
  0x24   :  { %v32_v9 = vadd.f32 2.0, %v79_v7 }
  0x25   :  { %v33_v10 = vmul.f32 %v77_v6, %v31_v8 }
  0x26   :  { %v34_v11 = vmul.f32 %v79_v7, %v32_v9 }
  0x27   :  { %v35_v12 = vadd.f32 2.0, %v33_v10 }
  0x28   :  { %v36_v13 = vadd.f32 2.0, %v34_v11 }
  0x29   :  { %80 = vrcp.f32 %v35_v12 }
  0x2a   :  { %82 = vrcp.f32 %v36_v13 }
  0x33   :  { %v81_v14 = vpop.eup %80 }
  0x34   :  { %v83_v15 = vpop.eup %82  ;;  %v39_v16 = vmul.f32 %v81_v14, %v35_v12 }
  0x35   :  { %v40_v17 = vmul.f32 %v83_v15, %v36_v13 }
  0x36   :  { %v41_v18 = vsub.f32 2.0, %v39_v16 }
  0x37   :  { %v42_v19 = vsub.f32 2.0, %v40_v17 }
  0x38   :  { %v43_v20 = vmul.f32 %v81_v14, %v41_v18 }
  0x39   :  { %v44_v21 = vmul.f32 %v83_v15, %v42_v19 }
  0x3a   :  { %v47_v22 = vmul.f32 %v43_v20, %v33_v10 }
  0x3b   :  { %v48_v23 = vmul.f32 %v44_v21, %v34_v11 }
  0x3c   :  { %v49_v24 = vmul.f32 %v47_v22, %v23_v0 }
  0x3d   :  { %v50_v25 = vmul.f32 %v48_v23, %v24_v1 }
  0x3e   :  { %v51_v26 = vsel %vm45_vm0, %v23_v0, %v49_v24 }
  0x3f   :  { %53 = vst [vmem:[#allocation5] sm:$0xff] %v51_v26  ;;  %v52_v27 = vsel %vm46_vm1, %v24_v1, %v50_v25 }
  0x40   :  { %54 = vst [vmem:[#allocation5 + $0x8] sm:$0xff] %v52_v27 }
  0x41   :  { %117 = shalt.err (!%p114_p12)
}
  0x42   :  { %s118_s24 = scalar_lea.hbm %s177_s1, 256 }
  0x43   :  { %p119_p13 = scmp.ne.s32.totalorder %s177_s1, %s118_s24  ;;  %p122_p0 = scmp.lt.u32.totalorder %s118_s24, %s177_s1 }
  0x45   :  { %p124_p1 = pnand %p122_p0, %p119_p13 }
  0x47   :  { %127 = shalt.err (!%p124_p1)
}
  0x48   :  { %66 = dma.vmem_to_hbm [thread:$0]  %s61_s20, 256, %s177_s1, [#allocation4], %s133_s16, %s133_s16, %s134_s17  }
  0x49   :  { %130 = dma.done.wait [#allocation4], 256  }
  0x4a   :  { %131 = vsyncadd [#allocation4], 4294967040 }
  0x4b   :  { %70 = vsyncpa [#allocation3], 1 }
  0x4c   :  { %71 = vsyncpa [#allocation4], 1 }

</bundles_post_ra>
